<compile_context>
chip_gen: v6e
topology: v6e:2x2x1
jax: 0.10.0
libtpu: 0.0.40
codegen_flags: <defaults>
</compile_context>

<pallas_src>
import functools

import numpy as np
import jax
import jax.numpy as jnp
from jax.experimental import pallas as pl
from jax.experimental.pallas import tpu as pltpu


@functools.lru_cache(maxsize=None)
def _fused_dft_basis(H, W):
    """Fused [cos | sin] rfft2 basis.

    Returns (basis_bf16 of shape (hw_pad, 2*n_pad), n_pad, HWf, hw_pad) where
      Re(F[u, v]) =  x_flat @ basis[:, u*Wf + v]
      Im(F[u, v]) = -x_flat @ basis[:, n_pad + u*Wf + v]   (sign irrelevant for |F|)
    Rows beyond H*W and columns beyond HWf are zero (lane / sublane padding).
    """
    Wf = W // 2 + 1
    HWf = H * Wf
    HW = H * W
    n_pad = ((HWf + 127) // 128) * 128
    hw_pad = ((HW + 127) // 128) * 128

    h = np.arange(H)[:, None, None, None]
    w = np.arange(W)[None, :, None, None]
    u = np.arange(H)[None, None, :, None]
    v = np.arange(Wf)[None, None, None, :]
    phase = 2.0 * np.pi * (u * h / H + v * w / W)          # (H, W, H, Wf)
    dcos = np.cos(phase).reshape(HW, HWf)
    dsin = np.sin(phase).reshape(HW, HWf)

    basis = np.zeros((hw_pad, 2 * n_pad), np.float32)
    basis[:HW, :HWf] = dcos
    basis[:HW, n_pad:n_pad + HWf] = dsin
    # bf16 halves the VMEM of the grid-invariant basis (and it is only
    # single-buffered); |F| feeds a sigmoid gate, so ~0.5% rel. error is fine.
    return jnp.asarray(basis, dtype=jnp.bfloat16), n_pad, HWf, hw_pad


def _num_tensorcores():
    """Best-effort count of TensorCores sharing the Pallas grid (v7x = 2)."""
    try:
        info = pltpu.get_tpu_info()
        for attr in ("num_cores", "core_count", "tensorcore_count", "num_tensorcores"):
            v = getattr(info, attr, None)
            if v:
                return max(1, int(v))
    except Exception:
        pass
    try:
        kind = jax.devices()[0].device_kind.lower()
        if "v7" in kind:
            return 2
    except Exception:
        pass
    return 1


def _batches_per_tile(B, C, num_cores, max_rows=512):
    """Pick batches-per-tile (rows = bpt*C) for the matmul M dimension.

    Single-TC chips: largest legal tile (fewest grid steps). Multi-TC chips:
    largest tile that still leaves >= num_cores (ideally a multiple) grid steps
    so "parallel" sharding keeps every core busy. Rows are kept sublane-legal
    (multiple of 8) unless the tile covers the full B*C extent.
    """
    legal = [d for d in range(1, B + 1)
             if B % d == 0 and ((d * C) % 8 == 0 or d == B)]
    cands = [d for d in legal if d * C <= max_rows]
    if not cands:
        # C alone exceeds max_rows (or alignment forces a full-extent tile):
        # fall back to the smallest legal tile.
        cands = [min(legal)]
    if num_cores >= 2:
        even = [d for d in cands if (B // d) >= num_cores and (B // d) % num_cores == 0]
        if even:
            return max(even)
        multi = [d for d in cands if (B // d) >= num_cores]
        if multi:
            return max(multi)
    return max(cands)


def _block_diag(m, n_blocks):
    """Block-diagonal replication of m, built with a single kron (no scatter loop)."""
    if n_blocks == 1:
        return m
    return jnp.kron(jnp.eye(n_blocks, dtype=m.dtype), m)


def _spectral_attention_kernel(x_ref, basis_ref, w1_ref, w2_ref, out_ref,
                               *, n_pad, inv_hwf):
    # x_ref: (rows, hw_pad) f32 — rows = batches_per_tile * C, batch-major.
    # basis_ref: (hw_pad, 2*n_pad) bf16.  w1_ref/w2_ref: block-diag MLP weights.

    # One fused DFT matmul on the MXU: bf16 operands, f32 accumulation.
    # Cast directly off the ref load so the f32 x tile is not kept live across
    # the matmul / magnitude / reduction / MLP (re-loaded at the end).
    reim = jnp.dot(x_ref[...].astype(jnp.bfloat16), basis_ref[...],
                   preferred_element_type=jnp.float32)        # (rows, 2*n_pad)
    re = reim[:, :n_pad]
    im = reim[:, n_pad:]
    mag = jnp.sqrt(re * re + im * im)                         # padded cols -> 0

    # Mean |F| over the true H*Wf frequencies (padded columns contribute 0).
    desc = jnp.sum(mag, axis=1, keepdims=True) * inv_hwf      # (rows, 1)

    # Channel-gating MLP: gate = sigmoid(W2_blk @ relu(W1_blk @ desc)).
    # Tiny, off the critical path; elementwise math stays f32 (no bf16 VPU on v5e).
    hid = jnp.maximum(
        jnp.dot(w1_ref[...], desc, preferred_element_type=jnp.float32), 0.0)
    gate = jax.nn.sigmoid(
        jnp.dot(w2_ref[...], hid, preferred_element_type=jnp.float32))  # (rows, 1)

    # Re-load x from the VMEM tile (cheap vld) and broadcast the gate over lanes.
    out_ref[...] = x_ref[...] * gate


def spectral_attention(x, w1, w2, *, max_rows=512):
    """x: (B, C, H, W) f32; w1: (C//r, C); w2: (C, C//r). Returns (B, C, H, W)."""
    B, C, H, W = x.shape
    HW = H * W
    basis, n_pad, hwf, hw_pad = _fused_dft_basis(H, W)

    num_cores = _num_tensorcores()
    bpt = _batches_per_tile(B, C, num_cores, max_rows=max_rows)
    grid = (B // bpt,)
    rows = bpt * C

    w1b = _block_diag(w1, bpt)        # (bpt*Cr, bpt*C)
    w2b = _block_diag(w2, bpt)        # (bpt*C, bpt*Cr)

    xf = x.reshape(B * C, HW)
    if hw_pad != HW:
        # Lane-dense stores: pad the spatial (lane) dim to a 128 multiple.
        xf = jnp.pad(xf, ((0, 0), (0, hw_pad - HW)))

    kernel = functools.partial(_spectral_attention_kernel,
                               n_pad=n_pad, inv_hwf=float(1.0 / hwf))

    # Explicit scoped-VMEM budget: double-buffered x/out tiles + single-buffered
    # invariants, with headroom (default scoped limit is 16/32 MiB, well below
    # physical; keep the cap conservative for v7x's 64 MiB).
    tile_bytes = rows * hw_pad * 4
    needed = 2 * 2 * tile_bytes + basis.size * 2 + (w1b.size + w2b.size) * 4
    vmem_limit = int(min(max(needed * 1.5 + (2 << 20), 8 << 20), 100 << 20))

    out_flat = pl.pallas_call(
        kernel,
        out_shape=jax.ShapeDtypeStruct((B * C, hw_pad), x.dtype),
        grid=grid,
        in_specs=[
            pl.BlockSpec((rows, hw_pad), lambda g: (g, 0)),
            # Grid-invariant operands: single-buffer (constant index_map).
            pl.BlockSpec(basis.shape, lambda g: (0, 0), pipeline_mode=pl.Buffered(1)),
            pl.BlockSpec(w1b.shape, lambda g: (0, 0), pipeline_mode=pl.Buffered(1)),
            pl.BlockSpec(w2b.shape, lambda g: (0, 0), pipeline_mode=pl.Buffered(1)),
        ],
        out_specs=pl.BlockSpec((rows, hw_pad), lambda g: (g, 0)),
        compiler_params=pltpu.CompilerParams(
            dimension_semantics=("parallel",),
            vmem_limit_bytes=vmem_limit),
    )(xf, basis, w1b, w2b)

    if hw_pad != HW:
        out_flat = out_flat[:, :HW]
    return out_flat.reshape(B, C, H, W)


def _reference(x, w1, w2):
    xn = np.asarray(x, dtype=np.float64)
    freq = np.fft.rfft2(xn, axes=(-2, -1))
    mag = np.abs(freq)
    desc = mag.mean(axis=(-2, -1))                                    # (B, C)
    h = np.maximum(desc @ np.asarray(w1, np.float64).T, 0.0)
    gate = 1.0 / (1.0 + np.exp(-(h @ np.asarray(w2, np.float64).T)))
    return xn * gate[:, :, None, None]


if __name__ == "__main__":
    B, C, H, W = 2, 32, 16, 16
    reduction = 16
    Cr = C // reduction

    key = jax.random.PRNGKey(0)
    kx, k1, k2 = jax.random.split(key, 3)
    x = jax.random.normal(kx, (B, C, H, W), dtype=jnp.float32)
    # nn.Linear(C, C//r, bias=False).weight  -> (Cr, C)
    w1 = jax.random.normal(k1, (Cr, C), dtype=jnp.float32) * 0.1
    # nn.Linear(C//r, C, bias=False).weight  -> (C, Cr)
    w2 = jax.random.normal(k2, (C, Cr), dtype=jnp.float32) * 0.1

    out = jax.block_until_ready(spectral_attention(x, w1, w2))

    ref = _reference(x, w1, w2)
    np.testing.assert_allclose(np.asarray(out), ref, rtol=1e-2, atol=1e-2)
    print("KERNEL_OK")
</pallas_src>

<mosaic_0001>
module attributes {stable_mosaic.version = 11 : i64} {
  func.func @_spectral_attention_kernel(%arg0: i32, %arg1: memref<64x256xf32, #tpu.memory_space<vmem>>, %arg2: memref<256x512xbf16, #tpu.memory_space<vmem>>, %arg3: memref<4x64xf32, #tpu.memory_space<vmem>>, %arg4: memref<64x4xf32, #tpu.memory_space<vmem>>, %arg5: memref<64x256xf32, #tpu.memory_space<vmem>>) attributes {dimension_semantics = [#tpu.dimension_semantics<parallel>], iteration_bounds = array<i64: 1>, scalar_prefetch = 0 : i64, scratch_operands = 0 : i64, tpu.core_type = #tpu.core_type<tc>, window_params = [{transform_indices = @transform_0, window_bounds = array<i64: 64, 256>}, {pipeline_mode = #tpu.pipeline_mode<synchronous>, transform_indices = @transform_1, window_bounds = array<i64: 256, 512>}, {pipeline_mode = #tpu.pipeline_mode<synchronous>, transform_indices = @transform_2, window_bounds = array<i64: 4, 64>}, {pipeline_mode = #tpu.pipeline_mode<synchronous>, transform_indices = @transform_3, window_bounds = array<i64: 64, 4>}, {transform_indices = @transform_4, window_bounds = array<i64: 64, 256>}]} {
    %c0 = arith.constant 0 : index
    %c0_0 = arith.constant 0 : index
    %0 = vector.load %arg1[%c0, %c0_0] : memref<64x256xf32, #tpu.memory_space<vmem>>, vector<64x256xf32>
    %1 = arith.truncf %0 : vector<64x256xf32> to vector<64x256xbf16>
    %c0_1 = arith.constant 0 : index
    %c0_2 = arith.constant 0 : index
    %2 = vector.load %arg2[%c0_1, %c0_2] : memref<256x512xbf16, #tpu.memory_space<vmem>>, vector<256x512xbf16>
    %cst = arith.constant dense<0.000000e+00> : vector<64x512xf32>
    %3 = tpu.matmul %1, %2, %cst {dimension_numbers = #tpu.dot_dimension_numbers<[1], [0], [0], [1], [0, 0, 1, 1], [], []>} : vector<64x256xbf16>, vector<256x512xbf16>, vector<64x512xf32> -> vector<64x512xf32>
    %4 = vector.extract_strided_slice %3 {offsets = [0, 0], sizes = [64, 256], strides = [1, 1]} : vector<64x512xf32> to vector<64x256xf32>
    %5 = vector.extract_strided_slice %3 {offsets = [0, 256], sizes = [64, 256], strides = [1, 1]} : vector<64x512xf32> to vector<64x256xf32>
    %6 = arith.mulf %4, %4 : vector<64x256xf32>
    %7 = arith.mulf %5, %5 : vector<64x256xf32>
    %8 = arith.addf %6, %7 : vector<64x256xf32>
    %9 = math.sqrt %8 : vector<64x256xf32>
    %cst_3 = arith.constant dense<0.000000e+00> : vector<64xf32>
    %10 = vector.multi_reduction <add>, %9, %cst_3 [1] : vector<64x256xf32> to vector<64xf32>
    %11 = vector.shape_cast %10 : vector<64xf32> to vector<64x1xf32>
    %cst_4 = arith.constant 0.0069444445 : f32
    %12 = vector.broadcast %cst_4 : f32 to vector<64x1xf32>
    %13 = arith.mulf %11, %12 : vector<64x1xf32>
    %c0_5 = arith.constant 0 : index
    %c0_6 = arith.constant 0 : index
    %14 = vector.load %arg3[%c0_5, %c0_6] : memref<4x64xf32, #tpu.memory_space<vmem>>, vector<4x64xf32>
    %cst_7 = arith.constant dense<0.000000e+00> : vector<4x1xf32>
    %15 = tpu.matmul %14, %13, %cst_7 {dimension_numbers = #tpu.dot_dimension_numbers<[1], [0], [0], [1], [0, 0, 1, 1], [], []>} : vector<4x64xf32>, vector<64x1xf32>, vector<4x1xf32> -> vector<4x1xf32>
    %cst_8 = arith.constant 0.000000e+00 : f32
    %16 = vector.broadcast %cst_8 : f32 to vector<4x1xf32>
    %17 = arith.maximumf %15, %16 : vector<4x1xf32>
    %c0_9 = arith.constant 0 : index
    %c0_10 = arith.constant 0 : index
    %18 = vector.load %arg4[%c0_9, %c0_10] : memref<64x4xf32, #tpu.memory_space<vmem>>, vector<64x4xf32>
    %cst_11 = arith.constant dense<0.000000e+00> : vector<64x1xf32>
    %19 = tpu.matmul %18, %17, %cst_11 {dimension_numbers = #tpu.dot_dimension_numbers<[1], [0], [0], [1], [0, 0, 1, 1], [], []>} : vector<64x4xf32>, vector<4x1xf32>, vector<64x1xf32> -> vector<64x1xf32>
    %20 = arith.negf %19 : vector<64x1xf32>
    %21 = math.exp %20 : vector<64x1xf32>
    %cst_12 = arith.constant 1.000000e+00 : f32
    %22 = vector.broadcast %cst_12 : f32 to vector<64x1xf32>
    %23 = arith.addf %22, %21 : vector<64x1xf32>
    %24 = arith.divf %22, %23 : vector<64x1xf32>
    %c0_13 = arith.constant 0 : index
    %c0_14 = arith.constant 0 : index
    %25 = vector.load %arg1[%c0_13, %c0_14] : memref<64x256xf32, #tpu.memory_space<vmem>>, vector<64x256xf32>
    %26 = vector.broadcast %24 : vector<64x1xf32> to vector<64x256xf32>
    %27 = arith.mulf %25, %26 : vector<64x256xf32>
    %c0_15 = arith.constant 0 : index
    %c0_16 = arith.constant 0 : index
    %28 = vector.load %arg5[%c0_15, %c0_16] : memref<64x256xf32, #tpu.memory_space<vmem>>, vector<64x256xf32>
    tpu.vector_store %arg5[%c0_15, %c0_16], %27 {strides = array<i32>} : memref<64x256xf32, #tpu.memory_space<vmem>>, vector<64x256xf32>,
    return
  }
  func.func @transform_0(%arg0: i32) -> (i32, i32) {
    %c0_i32 = arith.constant 0 : i32
    %c0_i32_0 = arith.constant 0 : i32
    return %arg0, %c0_i32 : i32, i32
  }
  func.func @transform_1(%arg0: i32) -> (i32, i32) {
    %c0_i32 = arith.constant 0 : i32
    %c0_i32_0 = arith.constant 0 : i32
    %c0_i32_1 = arith.constant 0 : i32
    return %c0_i32, %c0_i32_0 : i32, i32
  }
  func.func @transform_2(%arg0: i32) -> (i32, i32) {
    %c0_i32 = arith.constant 0 : i32
    %c0_i32_0 = arith.constant 0 : i32
    %c0_i32_1 = arith.constant 0 : i32
    return %c0_i32, %c0_i32_0 : i32, i32
  }
  func.func @transform_3(%arg0: i32) -> (i32, i32) {
    %c0_i32 = arith.constant 0 : i32
    %c0_i32_0 = arith.constant 0 : i32
    %c0_i32_1 = arith.constant 0 : i32
    return %c0_i32, %c0_i32_0 : i32, i32
  }
  func.func @transform_4(%arg0: i32) -> (i32, i32) {
    %c0_i32 = arith.constant 0 : i32
    %c0_i32_0 = arith.constant 0 : i32
    return %arg0, %c0_i32 : i32, i32
  }
}

</mosaic_0001>

<bundles_post_ra>
// kernel: tpu_custom_call.1
= control target key start
LH: loop header
LB: loop body
LE: loop exit
PB: predicated region body
PF: predicated region fallthrough
CT: control target
= control target key end

     0   :  { %9 = vsyncpa [#allocation3], 0  ;;  %s1836_s0 = inlined_call_operand.hbm [shape: f32[64,256], index: 0, kind: input, shape index: {}]   ;;  %s1837_s1 = inlined_call_operand.hbm [shape: bf16[256,512], index: 1, kind: input, shape index: {}]   ;;  %s1838_s2 = inlined_call_operand.vmem [shape: f32[4,64], index: 2, kind: input, shape index: {}]   ;;  %s1839_s3 = inlined_call_operand.vmem [shape: f32[64,4], index: 3, kind: input, shape index: {}]   ;;  %s1840_s4 = inlined_call_operand.hbm [shape: f32[64,256], index: 4, kind: output, shape index: {}]  }
   0x1   :  { %10 = vsyncpa [#allocation6], 0 }
   0x2   :  { %11 = vsyncpa [#allocation4], 0  ;;  %s1519_s15 = smov [#allocation2]  }
   0x3   :  { %s17_s16 = sshll.u32 %s1519_s15, 4  ;;  %s18_s16 = int_to_ptr.vmem [resolvable:$true] %s17_s16 }
   0x4   :  { %s1461_s17 = scalar_lea.vmem %s18_s16, 2048  ;;  %p1466_p1 = scmp.lt.s32.totalorder %s18_s16, %s18_s16 }
   0x5   :  { %p1462_p0 = scmp.ne.s32.totalorder %s18_s16, %s1461_s17  ;;  %p1467_p2 = scmp.lt.s32.totalorder %s1461_s17, %s1461_s17 }
   0x7   :  { %p1468_p3 = por %p1467_p2, %p1466_p1 }
   0x9   :  { %p1469_p4 = pnand %p1468_p3, %p1462_p0 }
   0xb   :  { %1472 = shalt.err (!%p1469_p4)
}
   0xc   :  { %s1520_s18 = smov 256   ;;  %s1521_s19 = smov 16  }
   0xd   :  { %23 = dma.hbm_to_vmem [thread:$0]  %s1836_s0, 2048, %s18_s16, [#allocation3], %s1520_s18, %s1520_s18, %s1521_s19  }
   0xe   :  { %s1522_s22 = smov [#allocation5]  }
   0xf   :  { %s29_s23 = sshll.u32 %s1522_s22, 4  ;;  %s30_s23 = int_to_ptr.vmem [resolvable:$true] %s29_s23 }
  0x10   :  { %s1481_s24 = scalar_lea.vmem %s30_s23, 8192  ;;  %p1486_p6 = scmp.lt.s32.totalorder %s30_s23, %s30_s23 }
  0x11   :  { %p1482_p5 = scmp.ne.s32.totalorder %s30_s23, %s1481_s24  ;;  %p1487_p7 = scmp.lt.s32.totalorder %s1481_s24, %s1481_s24 }
  0x13   :  { %p1488_p8 = por %p1487_p7, %p1486_p6 }
  0x15   :  { %p1489_p9 = pnand %p1488_p8, %p1482_p5 }
  0x17   :  { %1492 = shalt.err (!%p1489_p9)
}
  0x18   :  { %35 = dma.hbm_to_vmem [thread:$0]  %s1837_s1, 8192, %s30_s23, [#allocation6], %s1520_s18, %s1520_s18, %s1521_s19  }
  0x19   :  { %1513 = dma.done.wait [#allocation3], 2048  }
  0x1a   :  { %1514 = vsyncadd [#allocation3], 4294965248 }
  0x1b   :  { %1515 = dma.done.wait [#allocation6], 8192  }
  0x1c   :  { %1516 = vsyncadd [#allocation6], 4294959104  ;;  %v1293_v0 = vld [vmem:[#allocation5 + $0xe4] ss:$16 sps:$4 sm:$0xff]   ;;  %v1295_v1 = vld [vmem:[#allocation5 + $0xec] ss:$16 sps:$4 sm:$0xff]  }
  0x1d   :  { %454 = vmatprep.subr.bf16.mxu0 %v1293_v0  ;;  %v1297_v2 = vld [vmem:[#allocation5 + $0xe0] ss:$16 sps:$4 sm:$0xff]   ;;  %v1298_v3 = vld [vmem:[#allocation5 + $0xe8] ss:$16 sps:$4 sm:$0xff]   ;;  %527 = vmatprep.subr.bf16.mxu1 %v1295_v1  ;;  %v1299_v4 = vld [vmem:[#allocation5 + $0xc4] ss:$16 sps:$4 sm:$0xff]  }
  0x1e   :  { %455 = vmatpush1.bf16.msra.mxu0 %v1297_v2  ;;  %528 = vmatpush1.bf16.msra.mxu1 %v1298_v3  ;;  %v1301_v5 = vld [vmem:[#allocation5 + $0xcc] ss:$16 sps:$4 sm:$0xff]   ;;  %v1303_v6 = vld [vmem:[#allocation5 + $0xc0] ss:$16 sps:$4 sm:$0xff]   ;;  %v1304_v7 = vld [vmem:[#allocation5 + $0xc8] ss:$16 sps:$4 sm:$0xff]  }
  0x1f   :  { %456 = vmatprep.subr.bf16.mxu0 %v1299_v4  ;;  %529 = vmatprep.subr.bf16.mxu1 %v1301_v5  ;;  %v1305_v8 = vld [vmem:[#allocation5 + $0xa4] ss:$16 sps:$4 sm:$0xff]   ;;  %v1307_v9 = vld [vmem:[#allocation5 + $0xac] ss:$16 sps:$4 sm:$0xff]   ;;  %v1309_v10 = vld [vmem:[#allocation5 + $0xa0] ss:$16 sps:$4 sm:$0xff]  }
  0x20   :  { %v1310_v11 = vld [vmem:[#allocation5 + $0xa8] ss:$16 sps:$4 sm:$0xff]   ;;  %v1311_v12 = vld [vmem:[#allocation5 + $0x84] ss:$16 sps:$4 sm:$0xff]   ;;  %v1313_v13 = vld [vmem:[#allocation5 + $0x8c] ss:$16 sps:$4 sm:$0xff]  }
  0x21   :  { %v1315_v14 = vld [vmem:[#allocation5 + $0x80] ss:$16 sps:$4 sm:$0xff]   ;;  %v1316_v15 = vld [vmem:[#allocation5 + $0x88] ss:$16 sps:$4 sm:$0xff]   ;;  %v1317_v16 = vld [vmem:[#allocation5 + $0x64] ss:$16 sps:$4 sm:$0xff]  }
  0x22   :  { %457 = vmatpush1.bf16.msra.mxu0 %v1303_v6  ;;  %530 = vmatpush1.bf16.msra.mxu1 %v1304_v7  ;;  %v1319_v17 = vld [vmem:[#allocation5 + $0x6c] ss:$16 sps:$4 sm:$0xff]   ;;  %v1321_v18 = vld [vmem:[#allocation5 + $0x60] ss:$16 sps:$4 sm:$0xff]   ;;  %v1322_v19 = vld [vmem:[#allocation5 + $0x68] ss:$16 sps:$4 sm:$0xff]  }
  0x23   :  { %458 = vmatprep.subr.bf16.mxu0 %v1305_v8  ;;  %531 = vmatprep.subr.bf16.mxu1 %v1307_v9  ;;  %v1323_v20 = vld [vmem:[#allocation5 + $0x44] ss:$16 sps:$4 sm:$0xff]   ;;  %v1325_v21 = vld [vmem:[#allocation5 + $0x4c] ss:$16 sps:$4 sm:$0xff]   ;;  %v1327_v22 = vld [vmem:[#allocation5 + $0x40] ss:$16 sps:$4 sm:$0xff]  }
  0x24   :  { %v1328_v23 = vld [vmem:[#allocation5 + $0x48] ss:$16 sps:$4 sm:$0xff]   ;;  %v1329_v24 = vld [vmem:[#allocation5 + $0x24] ss:$16 sps:$4 sm:$0xff]   ;;  %v1331_v25 = vld [vmem:[#allocation5 + $0x2c] ss:$16 sps:$4 sm:$0xff]  }
  0x25   :  { %v1333_v26 = vld [vmem:[#allocation5 + $0x20] ss:$16 sps:$4 sm:$0xff]   ;;  %v1334_v27 = vld [vmem:[#allocation5 + $0x28] ss:$16 sps:$4 sm:$0xff]   ;;  %v1335_v28 = vld [vmem:[#allocation5 + $0x4] ss:$16 sps:$4 sm:$0xff]  }
  0x26   :  { %459 = vmatpush1.bf16.msra.mxu0 %v1309_v10  ;;  %532 = vmatpush1.bf16.msra.mxu1 %v1310_v11  ;;  %v1337_v29 = vld [vmem:[#allocation5 + $0xc] ss:$16 sps:$4 sm:$0xff]   ;;  %v1339_v30 = vld [vmem:[#allocation5] ss:$16 sps:$4 sm:$0xff]   ;;  %v1340_v31 = vld [vmem:[#allocation5 + $0x8] ss:$16 sps:$4 sm:$0xff]  }
  0x27   :  { %460 = vmatprep.subr.bf16.mxu0 %v1311_v12  ;;  %533 = vmatprep.subr.bf16.mxu1 %v1313_v13  ;;  %v1341_v32 = vld [vmem:[#allocation5 + $0x1e4] ss:$16 sps:$4 sm:$0xff]   ;;  %v1343_v33 = vld [vmem:[#allocation5 + $0x1ec] ss:$16 sps:$4 sm:$0xff]   ;;  %v1345_v34 = vld [vmem:[#allocation5 + $0x1e0] ss:$16 sps:$4 sm:$0xff]  }
  0x28   :  { %v1346_v35 = vld [vmem:[#allocation5 + $0x1e8] ss:$16 sps:$4 sm:$0xff]   ;;  %v1347_v36 = vld [vmem:[#allocation5 + $0x1c4] ss:$16 sps:$4 sm:$0xff]   ;;  %v1349_v37 = vld [vmem:[#allocation5 + $0x1cc] ss:$16 sps:$4 sm:$0xff]  }
  0x29   :  { %v1351_v38 = vld [vmem:[#allocation5 + $0x1c0] ss:$16 sps:$4 sm:$0xff]   ;;  %v1352_v39 = vld [vmem:[#allocation5 + $0x1c8] ss:$16 sps:$4 sm:$0xff]   ;;  %v1353_v40 = vld [vmem:[#allocation5 + $0x1a4] ss:$16 sps:$4 sm:$0xff]  }
  0x2a   :  { %461 = vmatpush1.bf16.msra.mxu0 %v1315_v14  ;;  %534 = vmatpush1.bf16.msra.mxu1 %v1316_v15  ;;  %v1355_v41 = vld [vmem:[#allocation5 + $0x1ac] ss:$16 sps:$4 sm:$0xff]   ;;  %v1357_v42 = vld [vmem:[#allocation5 + $0x1a0] ss:$16 sps:$4 sm:$0xff]   ;;  %v1358_v43 = vld [vmem:[#allocation5 + $0x1a8] ss:$16 sps:$4 sm:$0xff]  }
  0x2b   :  { %462 = vmatprep.subr.bf16.mxu0 %v1317_v16  ;;  %535 = vmatprep.subr.bf16.mxu1 %v1319_v17  ;;  %v1359_v44 = vld [vmem:[#allocation5 + $0x184] ss:$16 sps:$4 sm:$0xff]   ;;  %v1361_v45 = vld [vmem:[#allocation5 + $0x18c] ss:$16 sps:$4 sm:$0xff]   ;;  %v1363_v48 = vld [vmem:[#allocation5 + $0x180] ss:$16 sps:$4 sm:$0xff]  }
  0x2c   :  { %v1564_v46 = vld [vmem:[#allocation2 + $0x8] sm:$0xff]  ;;  %v1566_v47 = vld [vmem:[#allocation2 + $0x18] sm:$0xff]  ;;  %v1365_v51 = vld [vmem:[#allocation5 + $0x164] ss:$16 sps:$4 sm:$0xff]  }
  0x2d   :  { %v1364_v49 = vld [vmem:[#allocation5 + $0x188] ss:$16 sps:$4 sm:$0xff]   ;;  %v63_v50 = vpack.c.bf16 %v1566_v47, %v1564_v46  ;;  %v1367_v52 = vld [vmem:[#allocation5 + $0x16c] ss:$16 sps:$4 sm:$0xff]   ;;  %v1369_v53 = vld [vmem:[#allocation5 + $0x160] ss:$16 sps:$4 sm:$0xff]  }
  0x2e   :  { %463 = vmatpush1.bf16.msra.mxu0 %v1321_v18  ;;  %536 = vmatpush1.bf16.msra.mxu1 %v1322_v19  ;;  %v1370_v54 = vld [vmem:[#allocation5 + $0x168] ss:$16 sps:$4 sm:$0xff]   ;;  %v1371_v55 = vld [vmem:[#allocation5 + $0x144] ss:$16 sps:$4 sm:$0xff]   ;;  %v1373_v56 = vld [vmem:[#allocation5 + $0x14c] ss:$16 sps:$4 sm:$0xff]  }
  0x2f   :  { %464 = vmatprep.subr.bf16.mxu0 %v1323_v20  ;;  %537 = vmatprep.subr.bf16.mxu1 %v1325_v21  ;;  %v1375_v57 = vld [vmem:[#allocation5 + $0x140] ss:$16 sps:$4 sm:$0xff]   ;;  %v1376_v58 = vld [vmem:[#allocation5 + $0x148] ss:$16 sps:$4 sm:$0xff]   ;;  %v1377_v59 = vld [vmem:[#allocation5 + $0x124] ss:$16 sps:$4 sm:$0xff]  }
  0x30   :  { %486 = vmatprep.mubr.bf16.mxu0 %v63_v50  ;;  %559 = vmatprep.mubr.bf16.mxu1 %v63_v50  ;;  %v1379_v60 = vld [vmem:[#allocation5 + $0x12c] ss:$16 sps:$4 sm:$0xff]   ;;  %v1381_v61 = vld [vmem:[#allocation5 + $0x120] ss:$16 sps:$4 sm:$0xff]   ;;  %v1382_v62 = vld [vmem:[#allocation5 + $0x128] ss:$16 sps:$4 sm:$0xff]  }
  0x31   :  { %v1383_v63 = vld [vmem:[#allocation5 + $0x104] ss:$16 sps:$4 sm:$0xff]   ;;  %v1385_v0 = vld [vmem:[#allocation5 + $0x10c] ss:$16 sps:$4 sm:$0xff]   ;;  %v1387_v1 = vld [vmem:[#allocation5 + $0x100] ss:$16 sps:$4 sm:$0xff]  }
  0x32   :  { %465 = vmatpush1.bf16.msra.mxu0 %v1327_v22  ;;  %538 = vmatpush1.bf16.msra.mxu1 %v1328_v23  ;;  %v1388_v2 = vld [vmem:[#allocation5 + $0x108] ss:$16 sps:$4 sm:$0xff]   ;;  %v1570_v3 = vld [vmem:[#allocation2] sm:$0xff]  ;;  %v1572_v4 = vld [vmem:[#allocation2 + $0x10] sm:$0xff] }
  0x33   :  { %466 = vmatprep.subr.bf16.mxu0 %v1329_v24  ;;  %539 = vmatprep.subr.bf16.mxu1 %v1331_v25  ;;  %v1574_v5 = vld [vmem:[#allocation2 + $0x28] sm:$0xff]  ;;  %v1576_v6 = vld [vmem:[#allocation2 + $0x38] sm:$0xff]  ;;  %v62_v7 = vpack.c.bf16 %v1572_v4, %v1570_v3  ;;  %v1582_v9 = vld [vmem:[#allocation2 + $0x20] sm:$0xff] }
  0x34   :  { %v65_v8 = vpack.c.bf16 %v1576_v6, %v1574_v5  ;;  %v1584_v10 = vld [vmem:[#allocation2 + $0x30] sm:$0xff]  ;;  %v1586_v11 = vld [vmem:[#allocation2 + $0x48] sm:$0xff]  ;;  %v1588_v12 = vld [vmem:[#allocation2 + $0x58] sm:$0xff] }
  0x35   :  { %v64_v13 = vpack.c.bf16 %v1584_v10, %v1582_v9  ;;  %v67_v14 = vpack.c.bf16 %v1588_v12, %v1586_v11  ;;  %v1594_v15 = vld [vmem:[#allocation2 + $0x40] sm:$0xff]  ;;  %v1596_v16 = vld [vmem:[#allocation2 + $0x50] sm:$0xff]  ;;  %v1598_v17 = vld [vmem:[#allocation2 + $0x68] sm:$0xff] }
  0x36   :  { %467 = vmatpush1.bf16.msra.mxu0 %v1333_v26  ;;  %540 = vmatpush1.bf16.msra.mxu1 %v1334_v27  ;;  %v1600_v18 = vld [vmem:[#allocation2 + $0x78] sm:$0xff]  ;;  %v66_v19 = vpack.c.bf16 %v1596_v16, %v1594_v15  ;;  %v1606_v21 = vld [vmem:[#allocation2 + $0x60] sm:$0xff]  ;;  %v1608_v22 = vld [vmem:[#allocation2 + $0x70] sm:$0xff] }
  0x37   :  { %468 = vmatprep.subr.bf16.mxu0 %v1335_v28  ;;  %541 = vmatprep.subr.bf16.mxu1 %v1337_v29  ;;  %v69_v20 = vpack.c.bf16 %v1600_v18, %v1598_v17  ;;  %v68_v23 = vpack.c.bf16 %v1608_v22, %v1606_v21 }
  0x3a   :  { %469 = vmatpush1.bf16.msra.mxu0 %v1339_v30  ;;  %542 = vmatpush1.bf16.msra.mxu1 %v1340_v31 }
  0x3b   :  { %470 = vmatprep.subr.bf16.mxu0 %v1341_v32  ;;  %543 = vmatprep.subr.bf16.mxu1 %v1343_v33 }
  0x3e   :  { %471 = vmatpush2.bf16.msra.mxu0 %v1345_v34  ;;  %544 = vmatpush2.bf16.msra.mxu1 %v1346_v35 }
  0x3f   :  { %472 = vmatprep.subr.bf16.mxu0 %v1347_v36  ;;  %545 = vmatprep.subr.bf16.mxu1 %v1349_v37 }
  0x42   :  { %473 = vmatpush2.bf16.msra.mxu0 %v1351_v38  ;;  %546 = vmatpush2.bf16.msra.mxu1 %v1352_v39 }
  0x43   :  { %474 = vmatprep.subr.bf16.mxu0 %v1353_v40  ;;  %547 = vmatprep.subr.bf16.mxu1 %v1355_v41 }
  0x46   :  { %475 = vmatpush2.bf16.msra.mxu0 %v1357_v42  ;;  %548 = vmatpush2.bf16.msra.mxu1 %v1358_v43 }
  0x47   :  { %476 = vmatprep.subr.bf16.mxu0 %v1359_v44  ;;  %549 = vmatprep.subr.bf16.mxu1 %v1361_v45 }
  0x4a   :  { %477 = vmatpush2.bf16.msra.mxu0 %v1363_v48  ;;  %550 = vmatpush2.bf16.msra.mxu1 %v1364_v49 }
  0x4b   :  { %478 = vmatprep.subr.bf16.mxu0 %v1365_v51  ;;  %551 = vmatprep.subr.bf16.mxu1 %v1367_v52 }
  0x4e   :  { %479 = vmatpush2.bf16.msra.mxu0 %v1369_v53  ;;  %552 = vmatpush2.bf16.msra.mxu1 %v1370_v54 }
  0x4f   :  { %480 = vmatprep.subr.bf16.mxu0 %v1371_v55  ;;  %553 = vmatprep.subr.bf16.mxu1 %v1373_v56 }
  0x52   :  { %481 = vmatpush2.bf16.msra.mxu0 %v1375_v57  ;;  %554 = vmatpush2.bf16.msra.mxu1 %v1376_v58 }
  0x53   :  { %482 = vmatprep.subr.bf16.mxu0 %v1377_v59  ;;  %555 = vmatprep.subr.bf16.mxu1 %v1379_v60 }
  0x56   :  { %483 = vmatpush2.bf16.msra.mxu0 %v1381_v61  ;;  %556 = vmatpush2.bf16.msra.mxu1 %v1382_v62 }
  0x57   :  { %484 = vmatprep.subr.bf16.mxu0 %v1383_v63  ;;  %557 = vmatprep.subr.bf16.mxu1 %v1385_v0 }
  0x5a   :  { %485 = vmatpush2.bf16.msra.mxu0 %v1387_v1  ;;  %558 = vmatpush2.bf16.msra.mxu1 %v1388_v2 }
  0x5d   :  { %487 = vmatmul.mubr.bf16.vlgmr.msra.gmra.mxu0 %v62_v7  ;;  %560 = vmatmul.mubr.bf16.vlgmr.msra.gmra.mxu1 %v62_v7 }
  0x5e   :  { %496 = vmatprep.mubr.bf16.mxu0 %v65_v8  ;;  %569 = vmatprep.mubr.bf16.mxu1 %v65_v8 }
  0x65   :  { %497 = vmatmul.mubr.bf16.gmra.mxu0 %v64_v13  ;;  %570 = vmatmul.mubr.bf16.gmra.mxu1 %v64_v13 }
  0x66   :  { %506 = vmatprep.mubr.bf16.mxu0 %v67_v14  ;;  %579 = vmatprep.mubr.bf16.mxu1 %v67_v14 }
  0x6d   :  { %507 = vmatmul.mubr.bf16.gmra.mxu0 %v66_v19  ;;  %580 = vmatmul.mubr.bf16.gmra.mxu1 %v66_v19 }
  0x6e   :  { %516 = vmatprep.mubr.bf16.mxu0 %v69_v20  ;;  %589 = vmatprep.mubr.bf16.mxu1 %v69_v20 }
  0x75   :  { %517 = vmatmul.mubr.bf16.gmra.mxu0 %v68_v23  ;;  %590 = vmatmul.mubr.bf16.gmra.mxu1 %v68_v23 }
 0x11d   :  { %v488_v24 = vpop.f32.mrf.mxu0  ;;  %v561_v25 = vpop.f32.mrf.mxu1 }
 0x11e   :  { %v600_v36 = vmul.f32 %v488_v24, %v488_v24  ;;  %v616_v37 = vmul.f32 %v561_v25, %v561_v25 }
 0x11f   :  { %v490_v26 = vpop.f32.mrf.mxu0  ;;  %v563_v27 = vpop.f32.mrf.mxu1 }
 0x120   :  { %v1616_v48 = vadd.f32 %v616_v37, %v600_v36  ;;  %v601_v54 = vmul.f32 %v490_v26, %v490_v26  ;;  %v617_v55 = vmul.f32 %v563_v27, %v563_v27 }
 0x121   :  { %v492_v28 = vpop.f32.mrf.mxu0  ;;  %v565_v29 = vpop.f32.mrf.mxu1 }
 0x122   :  { %1389 = vrsqrt.f32 %v1616_v48  ;;  %v1628_v7 = vadd.f32 %v617_v55, %v601_v54  ;;  %v602_v8 = vmul.f32 %v492_v28, %v492_v28  ;;  %v618_v13 = vmul.f32 %v565_v29, %v565_v29 }
 0x123   :  { %v1612_v30 = vpop.f32.mrf.mxu0  ;;  %v1614_v31 = vpop.f32.mrf.mxu1  ;;  %vm650_vm1 = vcmp.eq.f32.partialorder %v1616_v48, inf  ;;  %vm652_vm15 = vcmp.eq.f32.partialorder %v1616_v48, 0.0 }
 0x124   :  { %vm657_vm2 = vcmp.eq.f32.partialorder %v1628_v7, inf  ;;  %vm659_vm14 = vcmp.eq.f32.partialorder %v1628_v7, 0.0 }
 0x125   :  { %v498_v32 = vpop.f32.mrf.mxu0  ;;  %v571_v33 = vpop.f32.mrf.mxu1 }
 0x126   :  { %v604_v40 = vmul.f32 %v498_v32, %v498_v32  ;;  %v620_v41 = vmul.f32 %v571_v33, %v571_v33  ;;  %v1639_v32 = vadd.f32 %v618_v13, %v602_v8  ;;  %v653_v8 = vand.u32 2147483648, %v1616_v48 }
 0x127   :  { %v500_v34 = vpop.f32.mrf.mxu0  ;;  %v573_v35 = vpop.f32.mrf.mxu1 }
 0x128   :  { %v605_v42 = vmul.f32 %v500_v34, %v500_v34  ;;  %v621_v43 = vmul.f32 %v573_v35, %v573_v35  ;;  %v1618_v51 = vadd.f32 %v620_v41, %v604_v40  ;;  %v603_v41 = vmul.f32 %v1612_v30, %v1612_v30 }
 0x129   :  { %v502_v38 = vpop.f32.mrf.mxu0  ;;  %v575_v39 = vpop.f32.mrf.mxu1 }
 0x12a   :  { %v1620_v56 = vadd.f32 %v621_v43, %v605_v42  ;;  %1391 = vrsqrt.f32 %v1618_v51  ;;  %v619_v42 = vmul.f32 %v1614_v31, %v1614_v31  ;;  %v606_v43 = vmul.f32 %v502_v38, %v502_v38 }
 0x12b   :  { %v504_v44 = vpop.f32.mrf.mxu0  ;;  %v577_v45 = vpop.f32.mrf.mxu1  ;;  %vm678_vm0 = vcmp.eq.f32.partialorder %v1618_v51, inf  ;;  %vm680_vm3 = vcmp.eq.f32.partialorder %v1618_v51, 0.0 }
 0x12c   :  { %1393 = vrsqrt.f32 %v1620_v56  ;;  %v607_v33 = vmul.f32 %v504_v44, %v504_v44  ;;  %v623_v34 = vmul.f32 %v577_v45, %v577_v45  ;;  %vm685_vm4 = vcmp.eq.f32.partialorder %v1620_v56, inf }
 0x12d   :  { %v508_v49 = vpop.f32.mrf.mxu0  ;;  %v581_v50 = vpop.f32.mrf.mxu1  ;;  %vm687_vm6 = vcmp.eq.f32.partialorder %v1620_v56, 0.0 }
 0x12e   :  { %v608_v52 = vmul.f32 %v508_v49, %v508_v49  ;;  %v624_v53 = vmul.f32 %v581_v50, %v581_v50  ;;  %v1651_v55 = vadd.f32 %v623_v34, %v607_v33 }
 0x12f   :  { %v510_v57 = vpop.f32.mrf.mxu0  ;;  %v583_v58 = vpop.f32.mrf.mxu1 }
 0x130   :  { %v609_v59 = vmul.f32 %v510_v57, %v510_v57  ;;  %v625_v60 = vmul.f32 %v583_v58, %v583_v58  ;;  %v1623_v61 = vadd.f32 %v624_v53, %v608_v52  ;;  %v622_v53 = vmul.f32 %v575_v39, %v575_v39  ;;  %v1390_v39 = vpop.eup %1389 }
 0x131   :  { %v512_v62 = vpop.f32.mrf.mxu0  ;;  %v585_v63 = vpop.f32.mrf.mxu1 }
 0x132   :  { %v1626_v0 = vadd.f32 %v625_v60, %v609_v59  ;;  %v610_v1 = vmul.f32 %v512_v62, %v512_v62  ;;  %v626_v2 = vmul.f32 %v585_v63, %v585_v63  ;;  %v1656_v59 = vadd.f32 %v619_v42, %v603_v41 }
 0x133   :  { %v514_v14 = vpop.f32.mrf.mxu0  ;;  %v587_v19 = vpop.f32.mrf.mxu1  ;;  %v1659_v60 = vadd.f32 %v622_v53, %v606_v43  ;;  %vm706_vm5 = vcmp.eq.f32.partialorder %v1623_v61, inf  ;;  %vm708_vm8 = vcmp.eq.f32.partialorder %v1623_v61, 0.0 }
 0x134   :  { %1395 = vrsqrt.f32 %v1626_v0  ;;  %v1632_v20 = vadd.f32 %v626_v2, %v610_v1  ;;  %v611_v23 = vmul.f32 %v514_v14, %v514_v14  ;;  %v627_v24 = vmul.f32 %v587_v19, %v587_v19 }
 0x135   :  { %1397 = vrsqrt.f32 %v1623_v61  ;;  %v518_v25 = vpop.f32.mrf.mxu0  ;;  %v591_v26 = vpop.f32.mrf.mxu1  ;;  %v660_v14 = vand.u32 2147483648, %v1628_v7  ;;  %vm713_vm9 = vcmp.eq.f32.partialorder %v1626_v0, inf  ;;  %vm715_vm13 = vcmp.eq.f32.partialorder %v1626_v0, 0.0 }
 0x136   :  { %1399 = vrsqrt.f32 %v1632_v20  ;;  %v1636_v27 = vadd.f32 %v627_v24, %v611_v23  ;;  %v612_v28 = vmul.f32 %v518_v25, %v518_v25  ;;  %v628_v29 = vmul.f32 %v591_v26, %v591_v26 }
 0x137   :  { %1401 = vrsqrt.f32 %v1628_v7  ;;  %v520_v35 = vpop.f32.mrf.mxu0  ;;  %v593_v36 = vpop.f32.mrf.mxu1  ;;  %v681_v23 = vand.u32 2147483648, %v1618_v51  ;;  %v688_v24 = vand.u32 2147483648, %v1620_v56  ;;  %vm720_vm7 = vcmp.eq.f32.partialorder %v1632_v20, inf }
 0x138   :  { %1403 = vrsqrt.f32 %v1636_v27  ;;  %v613_v37 = vmul.f32 %v520_v35, %v520_v35  ;;  %v629_v40 = vmul.f32 %v593_v36, %v593_v36  ;;  %v1646_v49 = vadd.f32 %v628_v29, %v612_v28  ;;  %v1392_v63 = vpop.eup %1391 }
 0x139   :  { %v522_v50 = vpop.f32.mrf.mxu0  ;;  %v595_v52 = vpop.f32.mrf.mxu1  ;;  %1405 = vrsqrt.f32 %v1639_v32  ;;  %v649_v29 = vmul.f32 %v1390_v39, %v1616_v48  ;;  %v677_v34 = vmul.f32 %v1392_v63, %v1618_v51  ;;  %v723_v41 = vand.u32 2147483648, %v1632_v20 }
 0x13a   :  { %v1648_v44 = vadd.f32 %v629_v40, %v613_v37  ;;  %v614_v45 = vmul.f32 %v522_v50, %v522_v50  ;;  %v630_v54 = vmul.f32 %v595_v52, %v595_v52  ;;  %v1394_v1 = vpop.eup %1393  ;;  %vm727_vm10 = vcmp.eq.f32.partialorder %v1636_v27, inf }
 0x13b   :  { %v524_v57 = vpop.f32.mrf.mxu0  ;;  %v597_v58 = vpop.f32.mrf.mxu1  ;;  %v684_v40 = vmul.f32 %v1394_v1, %v1620_v56  ;;  %v730_v42 = vand.u32 2147483648, %v1636_v27  ;;  %vm722_vm11 = vcmp.eq.f32.partialorder %v1632_v20, 0.0  ;;  %vm729_vm12 = vcmp.eq.f32.partialorder %v1636_v27, 0.0 }
 0x13c   :  { %1407 = vrsqrt.f32 %v1648_v44  ;;  %v1654_v30 = vadd.f32 %v630_v54, %v614_v45  ;;  %v615_v31 = vmul.f32 %v524_v57, %v524_v57  ;;  %v631_v38 = vmul.f32 %v597_v58, %v597_v58 }
 0x13d   :  { %1409 = vrsqrt.f32 %v1646_v49  ;;  %v716_v58 = vand.u32 2147483648, %v1626_v0  ;;  %v709_v1 = vand.u32 2147483648, %v1623_v61 }
 0x13e   :  { %1411 = vrsqrt.f32 %v1654_v30  ;;  %v1662_v62 = vadd.f32 %v631_v38, %v615_v31  ;;  %v679_v31 = vsel %vm678_vm0, %v1618_v51, %v677_v34  ;;  %vm734_vm0 = vcmp.eq.f32.partialorder %v1646_v49, inf }
 0x13f   :  { %1413 = vrsqrt.f32 %v1651_v55 }
 0x140   :  { %1415 = vrsqrt.f32 %v1662_v62 }
 0x141   :  { %v1396_v2 = vpop.eup %1395  ;;  %1417 = vrsqrt.f32 %v1656_v59 }
 0x142   :  { %v1398_v13 = vpop.eup %1397  ;;  %1419 = vrsqrt.f32 %v1659_v60  ;;  %v712_v28 = vmul.f32 %v1396_v2, %v1626_v0 }
 0x143   :  { %v1400_v19 = vpop.eup %1399  ;;  %v705_v37 = vmul.f32 %v1398_v13, %v1623_v61  ;;  %v651_v13 = vsel %vm650_vm1, %v1616_v48, %v649_v29  ;;  %vm748_vm1 = vcmp.eq.f32.partialorder %v1654_v30, inf }
 0x144   :  { %v1402_v25 = vpop.eup %1401  ;;  %v719_v26 = vmul.f32 %v1400_v19, %v1632_v20  ;;  %v714_v53 = vsel %vm713_vm9, %v1626_v0, %v712_v28  ;;  %v682_v0 = vsel %vm680_vm3, %v681_v23, %v679_v31  ;;  %vm755_vm3 = vcmp.eq.f32.partialorder %v1662_v62, inf }
 0x145   :  { %v1404_v33 = vpop.eup %1403  ;;  %v656_v43 = vmul.f32 %v1402_v25, %v1628_v7  ;;  %v717_v2 = vsel %vm715_vm13, %v716_v58, %v714_v53  ;;  %vm692_vm9 = vcmp.eq.f32.partialorder %v1659_v60, inf  ;;  %vm664_vm13 = vcmp.eq.f32.partialorder %v1639_v32, inf }
 0x146   :  { %v721_v35 = vsel %vm720_vm7, %v1632_v20, %v719_v26  ;;  %v726_v36 = vmul.f32 %v1404_v33, %v1636_v27  ;;  %v1694_v50 = vpop.eup %1405  ;;  %v707_v20 = vsel %vm706_vm5, %v1623_v61, %v705_v37  ;;  %vm757_vm5 = vcmp.eq.f32.partialorder %v1662_v62, 0.0 }
 0x147   :  { %v724_v54 = vsel %vm722_vm11, %v723_v41, %v721_v35  ;;  %v658_v19 = vsel %vm657_vm2, %v1628_v7, %v656_v43  ;;  %v710_v29 = vsel %vm708_vm8, %v709_v1, %v707_v20  ;;  %vm750_vm2 = vcmp.eq.f32.partialorder %v1654_v30, 0.0 }
 0x148   :  { %v728_v52 = vsel %vm727_vm10, %v1636_v27, %v726_v36  ;;  %v686_v27 = vsel %vm685_vm4, %v1620_v56, %v684_v40  ;;  %v772_v23 = vadd.f32 %v717_v2, %v710_v29  ;;  %v751_v41 = vand.u32 2147483648, %v1654_v30 }
 0x149   :  { %v1408_v45 = vpop.eup %1407  ;;  %v731_v57 = vsel %vm729_vm12, %v730_v42, %v728_v52  ;;  %v689_v34 = vsel %vm687_vm6, %v688_v24, %v686_v27  ;;  %v758_v56 = vand.u32 2147483648, %v1662_v62  ;;  %vm741_vm4 = vcmp.eq.f32.partialorder %v1648_v44, inf }
 0x14a   :  { %v1410_v38 = vpop.eup %1409  ;;  %v775_v39 = vadd.f32 %v731_v57, %v724_v54  ;;  %v740_v28 = vmul.f32 %v1408_v45, %v1648_v44  ;;  %v766_v43 = vadd.f32 %v689_v34, %v682_v0  ;;  %v744_v45 = vand.u32 2147483648, %v1648_v44 }
 0x14b   :  { %v1412_v63 = vpop.eup %1411  ;;  %v733_v37 = vmul.f32 %v1410_v38, %v1646_v49  ;;  %vm743_vm6 = vcmp.eq.f32.partialorder %v1648_v44, 0.0  ;;  %v661_v58 = vsel %vm659_vm14, %v660_v14, %v658_v19  ;;  %vm699_vm7 = vcmp.eq.f32.partialorder %v1651_v55, inf }
 0x14c   :  { %v1414_v25 = vpop.eup %1413  ;;  %776 = vadd.xlane.f32.xlu1 %v775_v39  ;;  %v747_v26 = vmul.f32 %v1412_v63, %v1654_v30  ;;  %v742_v24 = vsel %vm741_vm4, %v1648_v44, %v740_v28  ;;  %vm736_vm8 = vcmp.eq.f32.partialorder %v1646_v49, 0.0  ;;  %v654_v7 = vsel %vm652_vm15, %v653_v8, %v651_v13 }
 0x14d   :  { %v1416_v33 = vpop.eup %1415  ;;  %v698_v42 = vmul.f32 %v1414_v25, %v1651_v55  ;;  %v735_v57 = vsel %vm734_vm0, %v1646_v49, %v733_v37  ;;  %v745_v31 = vsel %vm743_vm6, %v744_v45, %v742_v24  ;;  %vm701_vm10 = vcmp.eq.f32.partialorder %v1651_v55, 0.0 }
 0x14e   :  { %v1418_v51 = vpop.eup %1417  ;;  %v749_v35 = vsel %vm748_vm1, %v1654_v30, %v747_v26  ;;  %v754_v36 = vmul.f32 %v1416_v33, %v1662_v62  ;;  %v737_v30 = vand.u32 2147483648, %v1646_v49  ;;  %v702_v39 = vand.u32 2147483648, %v1651_v55 }
 0x14f   :  { %v1420_v40 = vpop.eup %1419  ;;  %v752_v52 = vsel %vm750_vm2, %v751_v41, %v749_v35  ;;  %v700_v44 = vsel %vm699_vm7, %v1651_v55, %v698_v42  ;;  %v670_v38 = vmul.f32 %v1418_v51, %v1656_v59  ;;  %v760_v20 = vadd.f32 %v661_v58, %v654_v7  ;;  %v792_v42 = vld [vmem:[%s1838_s2] sm:$0xf] }
 0x150   :  { %773 = vadd.xlane.f32.xlu1 %v772_v23  ;;  %v756_v61 = vsel %vm755_vm3, %v1662_v62, %v754_v36  ;;  %v691_v62 = vmul.f32 %v1420_v40, %v1659_v60  ;;  %v738_v14 = vsel %vm736_vm8, %v737_v30, %v735_v57  ;;  %v663_v63 = vmul.f32 %v1694_v50, %v1639_v32  ;;  %v869_v57 = vld [vmem:[%s1839_s3 + $0x8] sm:$0xff]  ;;  %v872_v58 = vld [vmem:[%s1839_s3 + $0x20] sm:$0xff] }
 0x151   :  { %v759_v53 = vsel %vm757_vm5, %v758_v56, %v756_v61  ;;  %v778_v27 = vadd.f32 %v745_v31, %v738_v14  ;;  %v695_v1 = vand.u32 2147483648, %v1659_v60  ;;  %v703_v2 = vsel %vm701_vm10, %v702_v39, %v700_v44  ;;  %v873_v30 = vld [vmem:[%s1839_s3 + $0x28] sm:$0xff]  ;;  %v874_v31 = vld [vmem:[%s1839_s3 + $0x30] sm:$0xff]  ;;  %v875_v44 = vld [vmem:[%s1839_s3 + $0x38] sm:$0xff] }
 0x152   :  { %v781_v54 = vadd.f32 %v759_v53, %v752_v52  ;;  %v693_v49 = vsel %vm692_vm9, %v1659_v60, %v691_v62  ;;  %vm671_vm11 = vcmp.eq.f32.partialorder %v1656_v59, inf  ;;  %vm694_vm12 = vcmp.eq.f32.partialorder %v1659_v60, 0.0  ;;  %v870_v52 = vld [vmem:[%s1839_s3 + $0x10] sm:$0xff]  ;;  %v871_v62 = vld [vmem:[%s1839_s3 + $0x18] sm:$0xff] }
 0x153   :  { %v672_v48 = vsel %vm671_vm11, %v1656_v59, %v670_v38  ;;  %v696_v8 = vsel %vm694_vm12, %v695_v1, %v693_v49  ;;  %v674_v55 = vand.u32 2147483648, %v1656_v59  ;;  %v665_v19 = vsel %vm664_vm13, %v1639_v32, %v663_v63 }
 0x154   :  { %767 = vadd.xlane.f32.xlu1 %v766_v43  ;;  %782 = vadd.xlane.f32.xlu0 %v781_v54  ;;  %v769_v13 = vadd.f32 %v703_v2, %v696_v8  ;;  %vm673_vm14 = vcmp.eq.f32.partialorder %v1656_v59, 0.0  ;;  %v667_v50 = vand.u32 2147483648, %v1639_v32  ;;  %vm666_vm15 = vcmp.eq.f32.partialorder %v1639_v32, 0.0  ;;  %v868_v43 = vld [vmem:[%s1839_s3] sm:$0xff]  ;;  %s1526_s3 = smov [#allocation7]  }
 0x155   :  { %v675_v25 = vsel %vm673_vm14, %v674_v55, %v672_v48  ;;  %v1523_v26 = vmov 0.0   ;;  %vm1524_vm0 = vmmov 0   ;;  %vm793_vm1 = vcmask 523264   ;;  %s1135_s16 = sshll.u32 %s1526_s3, 4  ;;  %s1136_s16 = int_to_ptr.vmem [resolvable:$true] %s1135_s16 }
 0x156   :  { %v668_v0 = vsel %vm666_vm15, %v667_v50, %v665_v19  ;;  %1248 = vmatprep.subr.mxu0 %v1523_v26  ;;  %1264 = vmatprep.mubr.msk.f32.mxu0 %vm1524_vm0, %v1523_v26  ;;  %vm876_vm2 = vcmask 31744   ;;  %vm901_vm3 = vcmask 1043456   ;;  %v1525_v38 = vmov 0   ;;  %s1493_s17 = scalar_lea.vmem %s1136_s16, 2048  ;;  %p1498_p11 = scmp.lt.s32.totalorder %s1136_s16, %s1136_s16 }
 0x157   :  { %v763_v60 = vadd.f32 %v675_v25, %v668_v0  ;;  %1272 = vmatprep.mubr.msk.f32.mxu1 %vm876_vm2, %v870_v52  ;;  %1292 = vset.pattern.permute.xlu1 %v1525_v38  ;;  %p1494_p10 = scmp.ne.s32.totalorder %s1136_s16, %s1493_s17  ;;  %p1499_p12 = scmp.lt.s32.totalorder %s1493_s17, %s1493_s17 }
 0x158   :  { %761 = vadd.xlane.f32.xlu1 %v760_v20  ;;  %779 = vadd.xlane.f32.xlu0 %v778_v27 }
 0x159   :  { %1291 = vset.pattern.permute.xlu0 %v1525_v38  ;;  %p1500_p13 = por %p1499_p12, %p1498_p11 }
 0x15b   :  { %p1501_p0 = pnand %p1500_p13, %p1494_p10 }
 0x15c   :  { %770 = vadd.xlane.f32.xlu0 %v769_v13 }
 0x160   :  { %764 = vadd.xlane.f32.xlu0 %v763_v60 }
 0x1d5   :  { %v777_v28 = vpop.xlane.xlu1 %776 }
 0x1d6   :  { %v789_v23 = vmul.f32 0.0069444445, %v777_v28 }
 0x1d9   :  { %v774_v34 = vpop.xlane.xlu1 %773 }
 0x1da   :  { %v788_v36 = vmul.f32 0.0069444445, %v774_v34 }
 0x1dd   :  { %v783_v33 = vpop.xlane.xlu0 %782  ;;  %v768_v35 = vpop.xlane.xlu1 %767 }
 0x1de   :  { %v791_v29 = vmul.f32 0.0069444445, %v783_v33  ;;  %v786_v41 = vmul.f32 0.0069444445, %v768_v35 }
 0x1e0   :  { %1249 = vmatpush3.msra.mxu0 %v791_v29 }
 0x1e1   :  { %v780_v51 = vpop.xlane.xlu0 %779  ;;  %1250 = vmatprep.subr.mxu0 %v1523_v26  ;;  %v762_v56 = vpop.xlane.xlu1 %761 }
 0x1e2   :  { %v790_v59 = vmul.f32 0.0069444445, %v780_v51  ;;  %v784_v24 = vmul.f32 0.0069444445, %v762_v56 }
 0x1e4   :  { %1251 = vmatpush3.msra.mxu0 %v790_v59 }
 0x1e5   :  { %1252 = vmatprep.subr.mxu0 %v1523_v26  ;;  %v771_v32 = vpop.xlane.xlu0 %770 }
 0x1e6   :  { %1253 = vmatpush3.msra.mxu0 %v789_v23  ;;  %v787_v37 = vmul.f32 0.0069444445, %v771_v32 }
 0x1e7   :  { %1254 = vmatprep.subr.mxu0 %v1523_v26 }
 0x1e8   :  { %1255 = vmatpush3.msra.mxu0 %v788_v36 }
 0x1e9   :  { %1256 = vmatprep.subr.mxu0 %v1523_v26  ;;  %v765_v40 = vpop.xlane.xlu0 %764 }
 0x1ea   :  { %1257 = vmatpush3.msra.mxu0 %v787_v37  ;;  %v785_v61 = vmul.f32 0.0069444445, %v765_v40 }
 0x1eb   :  { %1258 = vmatprep.subr.mxu0 %v1523_v26 }
 0x1ec   :  { %1259 = vmatpush3.msra.mxu0 %v786_v41 }
 0x1ed   :  { %1260 = vmatprep.subr.mxu0 %v1523_v26 }
 0x1ee   :  { %1261 = vmatpush3.msra.mxu0 %v785_v61 }
 0x1ef   :  { %1262 = vmatprep.subr.mxu0 %v1523_v26 }
 0x1f0   :  { %1263 = vmatpush3.msra.mxu0 %v784_v24 }
 0x1f1   :  { %1265 = vmatmul.mubr.msk.f32.vlgmr.msra.gmra.mxu0 %vm793_vm1, %v792_v42 }
 0x1f2   :  { %1269 = vmatprep.mubr.msk.f32.mxu0 %vm876_vm2, %v868_v43 }
 0x2b1   :  { %v863_v53 = vpop.f32.mrf.mxu0 }
 0x2b2   :  { %v867_v45 = vmax.f32 %v863_v53, 0.0 }
 0x2b3   :  { %v1266_v54 = vpop.f32.mrf.mxu0 }
 0x2b4   :  { %1267 = vmatprep.subr.msk.mxu0 %vm901_vm3, %v867_v45  ;;  %1281 = vmatprep.subr.msk.mxu1 %vm901_vm3, %v867_v45 }
 0x2b5   :  { %1268 = vmatpush3.msk.msra.mxu0 %vm901_vm3, %v867_v45  ;;  %1282 = vmatpush3.msk.msra.mxu1 %vm901_vm3, %v867_v45 }
 0x2b6   :  { %1270 = vmatmul.mubr.msk.f32.vlgmr.msra.gmra.mxu0 %vm876_vm2, %v869_v57  ;;  %1273 = vmatmul.mubr.msk.f32.vlgmr.msra.gmra.mxu1 %vm876_vm2, %v871_v62 }
 0x2b7   :  { %1275 = vmatprep.mubr.msk.f32.mxu1 %vm876_vm2, %v872_v58 }
 0x2ba   :  { %1276 = vmatmul.mubr.msk.f32.gmra.mxu1 %vm876_vm2, %v873_v30 }
 0x2bb   :  { %1278 = vmatprep.mubr.msk.f32.mxu1 %vm876_vm2, %v874_v31 }
 0x2be   :  { %1279 = vmatmul.mubr.msk.f32.gmra.mxu1 %vm876_vm2, %v875_v44 }
 0x376   :  { %v1271_v7 = vpop.f32.mrf.mxu0  ;;  %v1274_v14 = vpop.f32.mrf.mxu1 }
 0x377   :  { %v1223_v39 = vmul.f32 -1.442695, %v1271_v7  ;;  %v1225_v20 = vmul.f32 -1.442695, %v1274_v14 }
 0x378   :  { %v981_v27 = vpop.f32.mrf.mxu1  ;;  %v971_v49 = vpop.f32.mrf.mxu0 }
 0x379   :  { %1421 = vpow2.f32 %v1223_v39  ;;  %v1224_v63 = vmul.f32 -1.442695, %v981_v27  ;;  %v1222_v1 = vmul.f32 -1.442695, %v971_v49 }
 0x37a   :  { %1423 = vpow2.f32 %v1225_v20  ;;  %v1277_v2 = vpop.f32.mrf.mxu1 }
 0x37b   :  { %v1227_v48 = vmul.f32 -1.442695, %v1277_v2  ;;  %1425 = vpow2.f32 %v1222_v1 }
 0x37c   :  { %v991_v8 = vpop.f32.mrf.mxu1  ;;  %1427 = vpow2.f32 %v1224_v63 }
 0x37d   :  { %1429 = vpow2.f32 %v1227_v48  ;;  %v1226_v13 = vmul.f32 -1.442695, %v991_v8 }
 0x37e   :  { %v1280_v55 = vpop.f32.mrf.mxu1 }
 0x37f   :  { %1431 = vpow2.f32 %v1226_v13  ;;  %v1229_v33 = vmul.f32 -1.442695, %v1280_v55 }
 0x380   :  { %v1001_v19 = vpop.f32.mrf.mxu1 }
 0x381   :  { %v1228_v50 = vmul.f32 -1.442695, %v1001_v19 }
 0x383   :  { %1433 = vpow2.f32 %v1228_v50 }
 0x386   :  { %v1422_v25 = vpop.eup %1421 }
 0x387   :  { %v1424_v0 = vpop.eup %1423  ;;  %v1035_v60 = vadd.f32 1.0, %v1422_v25 }
 0x388   :  { %v1037_v26 = vadd.f32 1.0, %v1424_v0  ;;  %v1426_v28 = vpop.eup %1425 }
 0x389   :  { %1435 = vrcp.f32 %v1035_v60  ;;  %v1428_v29 = vpop.eup %1427  ;;  %v1034_v34 = vadd.f32 1.0, %v1426_v28 }
 0x38a   :  { %1437 = vrcp.f32 %v1037_v26  ;;  %v1430_v51 = vpop.eup %1429  ;;  %v1036_v59 = vadd.f32 1.0, %v1428_v29 }
 0x38b   :  { %1439 = vrcp.f32 %v1034_v34  ;;  %v1039_v23 = vadd.f32 1.0, %v1430_v51 }
 0x38c   :  { %1441 = vpow2.f32 %v1229_v33  ;;  %v1432_v35 = vpop.eup %1431 }
 0x38d   :  { %1443 = vrcp.f32 %v1036_v59  ;;  %v1038_v36 = vadd.f32 1.0, %v1432_v35 }
 0x38e   :  { %1445 = vrcp.f32 %v1039_v23 }
 0x38f   :  { %1447 = vrcp.f32 %v1038_v36 }
 0x390   :  { %v1434_v32 = vpop.eup %1433 }
 0x391   :  { %v1040_v56 = vadd.f32 1.0, %v1434_v32 }
 0x393   :  { %1449 = vrcp.f32 %v1040_v56 }
 0x396   :  { %v1436_v37 = vpop.eup %1435 }
 0x397   :  { %1065 = vperm.xlu1 %1292, %v1436_v37   ;;  %v1438_v40 = vpop.eup %1437 }
 0x398   :  { %v1440_v41 = vpop.eup %1439 }
 0x399   :  { %v1442_v61 = vpop.eup %1441  ;;  %1060 = vperm.xlu0 %1291, %v1440_v41  }
 0x39a   :  { %v1041_v24 = vadd.f32 1.0, %v1442_v61  ;;  %v1444_v42 = vpop.eup %1443 }
 0x39b   :  { %1075 = vperm.xlu1 %1292, %v1438_v40   ;;  %v1446_v43 = vpop.eup %1445 }
 0x39c   :  { %1451 = vrcp.f32 %v1041_v24  ;;  %v1448_v52 = vpop.eup %1447 }
 0x39f   :  { %1070 = vperm.xlu1 %1292, %v1444_v42  }
 0x3a0   :  { %v1450_v53 = vpop.eup %1449 }
 0x3a3   :  { %1085 = vperm.xlu1 %1292, %v1446_v43  }
 0x3a7   :  { %1080 = vperm.xlu1 %1292, %v1448_v52  }
 0x3a9   :  { %v1452_v45 = vpop.eup %1451 }
 0x3ab   :  { %1090 = vperm.xlu1 %1292, %v1450_v53  }
 0x3af   :  { %1095 = vperm.xlu1 %1292, %v1452_v45  }
 0x412   :  { %v1066_v54 = vpop.permute.xlu1 %1065 }
 0x413   :  { %v1100_v57 = vmul.f32 %v1066_v54, %v1572_v4  ;;  %v1101_v62 = vmul.f32 %v1066_v54, %v1566_v47 }
 0x414   :  { %v1061_v58 = vpop.permute.xlu0 %1060 }
 0x415   :  { %1116 = vst [vmem:[#allocation7 + $0x10] sm:$0xff] %v1100_v57  ;;  %1117 = vst [vmem:[#allocation7 + $0x18] sm:$0xff] %v1101_v62  ;;  %v1098_v31 = vmul.f32 %v1061_v58, %v1570_v3  ;;  %v1099_v44 = vmul.f32 %v1061_v58, %v1564_v46 }
 0x416   :  { %v1076_v30 = vpop.permute.xlu1 %1075 }
 0x417   :  { %v1104_v38 = vmul.f32 %v1076_v30, %v1584_v10  ;;  %v1105_v7 = vmul.f32 %v1076_v30, %v1576_v6  ;;  %1114 = vst [vmem:[#allocation7] sm:$0xff] %v1098_v31  ;;  %1115 = vst [vmem:[#allocation7 + $0x8] sm:$0xff] %v1099_v44 }
 0x419   :  { %1120 = vst [vmem:[#allocation7 + $0x30] sm:$0xff] %v1104_v38  ;;  %1121 = vst [vmem:[#allocation7 + $0x38] sm:$0xff] %v1105_v7 }
 0x41a   :  { %v1071_v14 = vpop.permute.xlu1 %1070 }
 0x41b   :  { %v1102_v4 = vmul.f32 %v1071_v14, %v1582_v9  ;;  %v1103_v47 = vmul.f32 %v1071_v14, %v1574_v5 }
 0x41d   :  { %1118 = vst [vmem:[#allocation7 + $0x20] sm:$0xff] %v1102_v4  ;;  %1119 = vst [vmem:[#allocation7 + $0x28] sm:$0xff] %v1103_v47 }
 0x41e   :  { %v1086_v39 = vpop.permute.xlu1 %1085 }
 0x41f   :  { %v1108_v3 = vmul.f32 %v1086_v39, %v1596_v16  ;;  %v1109_v46 = vmul.f32 %v1086_v39, %v1588_v12 }
 0x421   :  { %1124 = vst [vmem:[#allocation7 + $0x50] sm:$0xff] %v1108_v3  ;;  %1125 = vst [vmem:[#allocation7 + $0x58] sm:$0xff] %v1109_v46 }
 0x422   :  { %v1081_v10 = vpop.permute.xlu1 %1080 }
 0x423   :  { %v1106_v6 = vmul.f32 %v1081_v10, %v1594_v15  ;;  %v1107_v20 = vmul.f32 %v1081_v10, %v1586_v11 }
 0x425   :  { %1122 = vst [vmem:[#allocation7 + $0x40] sm:$0xff] %v1106_v6  ;;  %1123 = vst [vmem:[#allocation7 + $0x48] sm:$0xff] %v1107_v20 }
 0x426   :  { %v1091_v27 = vpop.permute.xlu1 %1090 }
 0x427   :  { %v1110_v9 = vmul.f32 %v1091_v27, %v1606_v21  ;;  %v1111_v5 = vmul.f32 %v1091_v27, %v1598_v17 }
 0x429   :  { %1126 = vst [vmem:[#allocation7 + $0x60] sm:$0xff] %v1110_v9  ;;  %1127 = vst [vmem:[#allocation7 + $0x68] sm:$0xff] %v1111_v5 }
 0x42a   :  { %v1096_v16 = vpop.permute.xlu1 %1095 }
 0x42b   :  { %v1112_v12 = vmul.f32 %v1096_v16, %v1608_v22  ;;  %v1113_v49 = vmul.f32 %v1096_v16, %v1600_v18 }
 0x42d   :  { %1128 = vst [vmem:[#allocation7 + $0x70] sm:$0xff] %v1112_v12  ;;  %1129 = vst [vmem:[#allocation7 + $0x78] sm:$0xff] %v1113_v49 }
 0x42e   :  { %1504 = shalt.err (!%p1501_p0)
}
 0x42f   :  { %1141 = dma.vmem_to_hbm [thread:$0]  %s1136_s16, 2048, %s1840_s4, [#allocation4], %s1520_s18, %s1520_s18, %s1521_s19  }
 0x430   :  { %1517 = dma.done.wait [#allocation4], 2048  }
 0x431   :  { %1518 = vsyncadd [#allocation4], 4294965248 }
 0x432   :  { %1145 = vsyncpa [#allocation3], 1 }
 0x433   :  { %1146 = vsyncpa [#allocation6], 1 }
 0x434   :  { %1147 = vsyncpa [#allocation4], 1 }

</bundles_post_ra>
